<compile_context>
chip_gen: v6e
topology: v6e:2x2x1
jax: 0.10.0
libtpu: 0.0.40
codegen_flags: <defaults>
</compile_context>

<pallas_src>
import functools

import jax
import jax.numpy as jnp
from jax.experimental import pallas as pl
from jax.experimental.pallas import tpu as pltpu


def _round_up(a, b):
    return (a + b - 1) // b * b


def _is_v5e():
    # v5e has no bf16 VALU/EUP: keep the final multiply in f32 there.
    try:
        kind = jax.devices()[0].device_kind.lower()
        return ("v5 lite" in kind) or ("v5e" in kind) or ("v5litepod" in kind)
    except Exception:
        return False


# ----------------------- primary single-pass kernel -----------------------

def _channel_attention_kernel(x_ref, w1t_ref, w2t_ref, o_ref, *, mul_in_f32):
    # x_ref/o_ref: (nb, C, HW) with HW the TRUE (unpadded) spatial size.
    x = x_ref[...]
    nb = x.shape[0]
    hw = x.shape[-1]

    # AdaptiveAvgPool2d(1) / AdaptiveMaxPool2d(1): reduce over HW.
    # No HBM padding was added (block == full extent), so no masking is needed;
    # sum accumulates in f32, max is exact in the native dtype.
    avg = jnp.sum(x, axis=-1, dtype=jnp.float32) * jnp.float32(1.0 / hw)   # (nb, C)
    mx = jnp.max(x, axis=-1).astype(jnp.float32)                           # (nb, C)

    # Fused shared MLP (the two 1x1 convs): avg & max rows in one matmul pair.
    pooled = jnp.concatenate([avg, mx], axis=0)                            # (2nb, C)
    h = jnp.maximum(jnp.dot(pooled, w1t_ref[...],
                            preferred_element_type=jnp.float32), 0.0)
    out = jnp.dot(h, w2t_ref[...], preferred_element_type=jnp.float32)     # (2nb, C)
    scale = jax.nn.sigmoid(out[:nb] + out[nb:])                            # (nb, C) f32

    if mul_in_f32:
        # f32 inputs (no cast temp) and v5e bf16 (f32 is the fast path there).
        o_ref[...] = (x.astype(jnp.float32) * scale[:, :, None]).astype(o_ref.dtype)
    else:
        # v6e/v7x bf16: native-dtype multiply, no f32 block temporary.
        o_ref[...] = x * scale[:, :, None].astype(x.dtype)


# ------------- fallback: HW-chunked two-pass path (huge slabs) -------------

def _pool_scale_kernel(x_ref, w1t_ref, w2t_ref, scale_ref, sum_acc, max_acc,
                       *, hw_true, hw_chunk):
    # Grid: (N, num_chunks). Accumulate per-channel sum/max across HW chunks,
    # then fuse MLP + sigmoid in the finalize step. scale_ref: (1, C, 1).
    k = pl.program_id(1)

    @pl.when(k == 0)
    def _():
        sum_acc[...] = jnp.zeros_like(sum_acc)
        max_acc[...] = jnp.full_like(max_acc, jnp.finfo(jnp.float32).min)

    xf = x_ref[...].astype(jnp.float32)                     # (1, C, hw_chunk)
    if hw_true % hw_chunk == 0:
        # Chunk divides HW exactly: no boundary garbage, no masking.
        sum_acc[...] += jnp.sum(xf, axis=-1)
        max_acc[...] = jnp.maximum(max_acc[...], jnp.max(xf, axis=-1))
    else:
        # Boundary block may contain unspecified data past HW: mask it.
        lane = jax.lax.broadcasted_iota(jnp.int32, xf.shape, 2) + k * hw_chunk
        valid = lane < hw_true
        neg = jnp.finfo(jnp.float32).min
        sum_acc[...] += jnp.sum(jnp.where(valid, xf, 0.0), axis=-1)
        max_acc[...] = jnp.maximum(
            max_acc[...], jnp.max(jnp.where(valid, xf, neg), axis=-1))

    @pl.when(k == pl.num_programs(1) - 1)
    def _():
        avg = sum_acc[...] * jnp.float32(1.0 / hw_true)                     # (1, C)
        pooled = jnp.concatenate([avg, max_acc[...]], axis=0)               # (2, C)
        h = jnp.maximum(jnp.dot(pooled, w1t_ref[...],
                                preferred_element_type=jnp.float32), 0.0)
        out = jnp.dot(h, w2t_ref[...], preferred_element_type=jnp.float32)  # (2, C)
        scale_ref[...] = jax.nn.sigmoid(out[:1] + out[1:2])[:, :, None]     # (1, C, 1)


def _apply_scale_kernel(x_ref, scale_ref, o_ref, *, mul_in_f32):
    x = x_ref[...]                 # (1, C, hw_chunk)
    s = scale_ref[...]             # (1, C, 1) f32
    if mul_in_f32:
        o_ref[...] = (x.astype(jnp.float32) * s).astype(o_ref.dtype)
    else:
        o_ref[...] = x * s.astype(x.dtype)


# ------------------------------- wrapper -----------------------------------

def channel_attention(x_nchw, w1, w2, *, target_tile_bytes=8 << 20,
                      single_batch_limit_bytes=10 << 20, hw_chunk=None):
    """x_nchw: (N, C, H, W); w1: (C_r, C); w2: (C, C_r). Returns (N, C, H, W)."""
    N, C, H, W = x_nchw.shape
    HW = H * W
    x_flat = x_nchw.reshape(N, C, HW)          # view-like reshape, no extra pass
    itemsize = x_flat.dtype.itemsize

    # Pre-transpose the 1x1-conv weights so the C-contraction is lane-major.
    w1t = jnp.asarray(w1, jnp.float32).T       # (C, C_r)
    w2t = jnp.asarray(w2, jnp.float32).T       # (C_r, C)
    w_bytes = (w1t.size + w2t.size) * 4

    mul_in_f32 = (x_flat.dtype == jnp.float32) or _is_v5e()

    # VMEM-honest footprint of one (C, HW) slab (sublane/lane padding in VMEM).
    c_vmem = _round_up(C, 8)
    hw_vmem = _round_up(HW, 128)
    per_batch_vmem = c_vmem * hw_vmem * itemsize

    use_chunked = (hw_chunk is not None) or (per_batch_vmem > single_batch_limit_bytes)

    if not use_chunked:
        # ---- primary path: one grid step = (nb, C, HW) slab, fully fused ----
        nb = max(1, int(target_tile_bytes // per_batch_vmem))
        min_steps = min(N, 4)                  # enough steps for pipelining / megacore
        nb = max(1, min(nb, N // min_steps))
        while N % nb:                          # divisor of N -> no batch-pad HBM pass
            nb -= 1
        grid = (N // nb,)

        block_vmem = nb * per_batch_vmem
        vmem_need = 4 * block_vmem + 2 * w_bytes + (2 << 20)
        vmem_limit = int(min(max(vmem_need, 16 << 20), 48 << 20))

        kernel = functools.partial(_channel_attention_kernel, mul_in_f32=mul_in_f32)
        out_flat = pl.pallas_call(
            kernel,
            out_shape=jax.ShapeDtypeStruct((N, C, HW), x_flat.dtype),
            grid_spec=pltpu.PrefetchScalarGridSpec(
                num_scalar_prefetch=0,
                grid=grid,
                in_specs=[
                    pl.BlockSpec((nb, C, HW), lambda n: (n, 0, 0)),
                    pl.BlockSpec(w1t.shape, lambda n: (0, 0)),   # VMEM-resident
                    pl.BlockSpec(w2t.shape, lambda n: (0, 0)),   # VMEM-resident
                ],
                out_specs=pl.BlockSpec((nb, C, HW), lambda n: (n, 0, 0)),
            ),
            compiler_params=pltpu.CompilerParams(
                dimension_semantics=("parallel",),
                vmem_limit_bytes=vmem_limit,
            ),
        )(x_flat, w1t, w2t)
        return out_flat.reshape(N, C, H, W)

    # ---- fallback: single-image slab too big for VMEM -> chunk HW, 2 passes ----
    if hw_chunk is None:
        hw_chunk = max(128, (target_tile_bytes // (c_vmem * itemsize)) // 128 * 128)
    hw_chunk = int(min(hw_chunk, hw_vmem))
    num_chunks = pl.cdiv(HW, hw_chunk)
    grid = (N, num_chunks)

    block_vmem = c_vmem * hw_chunk * itemsize
    vmem_need = 4 * block_vmem + 2 * w_bytes + (4 << 20)
    vmem_limit = int(min(max(vmem_need, 16 << 20), 48 << 20))

    # Pass 1: per-channel avg/max over HW chunks -> sigmoid(MLP) scale (N, C, 1).
    pool_kernel = functools.partial(_pool_scale_kernel, hw_true=HW, hw_chunk=hw_chunk)
    scale = pl.pallas_call(
        pool_kernel,
        out_shape=jax.ShapeDtypeStruct((N, C, 1), jnp.float32),
        grid_spec=pltpu.PrefetchScalarGridSpec(
            num_scalar_prefetch=0,
            grid=grid,
            in_specs=[
                pl.BlockSpec((1, C, hw_chunk), lambda n, k: (n, 0, k)),
                pl.BlockSpec(w1t.shape, lambda n, k: (0, 0)),
                pl.BlockSpec(w2t.shape, lambda n, k: (0, 0)),
            ],
            out_specs=pl.BlockSpec((1, C, 1), lambda n, k: (n, 0, 0)),
            scratch_shapes=[pltpu.VMEM((1, C), jnp.float32),
                            pltpu.VMEM((1, C), jnp.float32)],
        ),
        compiler_params=pltpu.CompilerParams(
            dimension_semantics=("parallel", "arbitrary"),
            vmem_limit_bytes=vmem_limit,
        ),
    )(x_flat, w1t, w2t)

    # Pass 2: broadcast-multiply x by the per-(n, c) scale, chunk by chunk.
    apply_kernel = functools.partial(_apply_scale_kernel, mul_in_f32=mul_in_f32)
    out_flat = pl.pallas_call(
        apply_kernel,
        out_shape=jax.ShapeDtypeStruct((N, C, HW), x_flat.dtype),
        grid_spec=pltpu.PrefetchScalarGridSpec(
            num_scalar_prefetch=0,
            grid=grid,
            in_specs=[
                pl.BlockSpec((1, C, hw_chunk), lambda n, k: (n, 0, k)),
                pl.BlockSpec((1, C, 1), lambda n, k: (n, 0, 0)),
            ],
            out_specs=pl.BlockSpec((1, C, hw_chunk), lambda n, k: (n, 0, k)),
        ),
        compiler_params=pltpu.CompilerParams(
            dimension_semantics=("parallel", "parallel"),
            vmem_limit_bytes=vmem_limit,
        ),
    )(x_flat, scale)
    return out_flat.reshape(N, C, H, W)


def _reference(x, w1, w2):
    # Plain-JAX mirror of the PyTorch forward.
    avg = jnp.mean(x, axis=(2, 3))                      # (N, C)
    mx = jnp.max(x, axis=(2, 3))                        # (N, C)
    fc = lambda p: jnp.maximum(p @ w1.T, 0.0) @ w2.T    # shared MLP
    return jax.nn.sigmoid(fc(avg) + fc(mx))[:, :, None, None] * x


if __name__ == "__main__":
    ratio = 16
    key = jax.random.PRNGKey(0)

    cases = [
        ((2, 32, 16, 16), {}),                  # lane-aligned HW, primary path
        ((2, 32, 7, 7), {}),                    # unaligned HW, full-extent block
        ((2, 32, 16, 16), {"hw_chunk": 128}),   # forced chunked path, exact chunks
        ((2, 32, 20, 15), {"hw_chunk": 128}),   # forced chunked path, ragged tail
    ]
    for (N, C, H, W), kwargs in cases:
        C_r = max(1, C // ratio)
        kx, k1, k2, key = jax.random.split(key, 4)
        x = jax.random.normal(kx, (N, C, H, W), dtype=jnp.float32)
        # Conv2d(C, C_r, 1, bias=False) weight (C_r, C, 1, 1) -> (C_r, C)
        w1 = jax.random.normal(k1, (C_r, C), dtype=jnp.float32) * 0.1
        # Conv2d(C_r, C, 1, bias=False) weight (C, C_r, 1, 1) -> (C, C_r)
        w2 = jax.random.normal(k2, (C, C_r), dtype=jnp.float32) * 0.1

        out = channel_attention(x, w1, w2, **kwargs)
        jax.block_until_ready(out)

        ref = _reference(x, w1, w2)
        assert jnp.allclose(out, ref, atol=1e-5, rtol=1e-5), \
            f"mismatch vs reference at shape {(N, C, H, W)} kwargs={kwargs}"

    print("KERNEL_OK")
</pallas_src>

<mosaic_0001>
module attributes {stable_mosaic.version = 11 : i64} {
  func.func @_channel_attention_kernel(%arg0: i32, %arg1: memref<1x32x256xf32, #tpu.memory_space<vmem>>, %arg2: memref<32x2xf32, #tpu.memory_space<vmem>>, %arg3: memref<2x32xf32, #tpu.memory_space<vmem>>, %arg4: memref<1x32x256xf32, #tpu.memory_space<vmem>>) attributes {dimension_semantics = [#tpu.dimension_semantics<parallel>], iteration_bounds = array<i64: 2>, scalar_prefetch = 0 : i64, scratch_operands = 0 : i64, tpu.core_type = #tpu.core_type<tc>, window_params = [{transform_indices = @transform_0, window_bounds = array<i64: 1, 32, 256>}, {pipeline_mode = #tpu.pipeline_mode<synchronous>, transform_indices = @transform_1, window_bounds = array<i64: 32, 2>}, {pipeline_mode = #tpu.pipeline_mode<synchronous>, transform_indices = @transform_2, window_bounds = array<i64: 2, 32>}, {transform_indices = @transform_3, window_bounds = array<i64: 1, 32, 256>}]} {
    %c0 = arith.constant 0 : index
    %c0_0 = arith.constant 0 : index
    %c0_1 = arith.constant 0 : index
    %0 = vector.load %arg1[%c0, %c0_0, %c0_1] : memref<1x32x256xf32, #tpu.memory_space<vmem>>, vector<1x32x256xf32>
    %cst = arith.constant dense<0.000000e+00> : vector<1x32xf32>
    %1 = vector.multi_reduction <add>, %0, %cst [2] : vector<1x32x256xf32> to vector<1x32xf32>
    %cst_2 = arith.constant 3.906250e-03 : f32
    %2 = vector.broadcast %cst_2 : f32 to vector<1x32xf32>
    %3 = arith.mulf %1, %2 : vector<1x32xf32>
    %cst_3 = arith.constant dense<0xFF800000> : vector<1x32xf32>
    %4 = vector.multi_reduction <maximumf>, %0, %cst_3 [2] : vector<1x32x256xf32> to vector<1x32xf32>
    %5 = tpu.concatenate %3, %4 in 0 : vector<1x32xf32>, vector<1x32xf32> -> vector<2x32xf32>
    %c0_4 = arith.constant 0 : index
    %c0_5 = arith.constant 0 : index
    %6 = vector.load %arg2[%c0_4, %c0_5] : memref<32x2xf32, #tpu.memory_space<vmem>>, vector<32x2xf32>
    %cst_6 = arith.constant dense<0.000000e+00> : vector<2x2xf32>
    %7 = tpu.matmul %5, %6, %cst_6 {dimension_numbers = #tpu.dot_dimension_numbers<[1], [0], [0], [1], [0, 0, 1, 1], [], []>} : vector<2x32xf32>, vector<32x2xf32>, vector<2x2xf32> -> vector<2x2xf32>
    %cst_7 = arith.constant 0.000000e+00 : f32
    %8 = vector.broadcast %cst_7 : f32 to vector<2x2xf32>
    %9 = arith.maximumf %7, %8 : vector<2x2xf32>
    %c0_8 = arith.constant 0 : index
    %c0_9 = arith.constant 0 : index
    %10 = vector.load %arg3[%c0_8, %c0_9] : memref<2x32xf32, #tpu.memory_space<vmem>>, vector<2x32xf32>
    %cst_10 = arith.constant dense<0.000000e+00> : vector<2x32xf32>
    %11 = tpu.matmul %9, %10, %cst_10 {dimension_numbers = #tpu.dot_dimension_numbers<[1], [0], [0], [1], [0, 0, 1, 1], [], []>} : vector<2x2xf32>, vector<2x32xf32>, vector<2x32xf32> -> vector<2x32xf32>
    %12 = vector.extract_strided_slice %11 {offsets = [0, 0], sizes = [1, 32], strides = [1, 1]} : vector<2x32xf32> to vector<1x32xf32>
    %13 = vector.extract_strided_slice %11 {offsets = [1, 0], sizes = [1, 32], strides = [1, 1]} : vector<2x32xf32> to vector<1x32xf32>
    %14 = arith.addf %12, %13 : vector<1x32xf32>
    %15 = arith.negf %14 : vector<1x32xf32>
    %16 = math.exp %15 : vector<1x32xf32>
    %cst_11 = arith.constant 1.000000e+00 : f32
    %17 = vector.broadcast %cst_11 : f32 to vector<1x32xf32>
    %18 = arith.addf %17, %16 : vector<1x32xf32>
    %19 = arith.divf %17, %18 : vector<1x32xf32>
    %20 = vector.shape_cast %19 : vector<1x32xf32> to vector<1x32x1xf32>
    %21 = vector.broadcast %20 : vector<1x32x1xf32> to vector<1x32x256xf32>
    %22 = arith.mulf %0, %21 : vector<1x32x256xf32>
    %c0_12 = arith.constant 0 : index
    %c0_13 = arith.constant 0 : index
    %c0_14 = arith.constant 0 : index
    %23 = vector.load %arg4[%c0_12, %c0_13, %c0_14] : memref<1x32x256xf32, #tpu.memory_space<vmem>>, vector<1x32x256xf32>
    tpu.vector_store %arg4[%c0_12, %c0_13, %c0_14], %22 {strides = array<i32>} : memref<1x32x256xf32, #tpu.memory_space<vmem>>, vector<1x32x256xf32>,
    return
  }
  func.func @transform_0(%arg0: i32) -> (i32, i32, i32) {
    %c0_i32 = arith.constant 0 : i32
    %c0_i32_0 = arith.constant 0 : i32
    %c0_i32_1 = arith.constant 0 : i32
    return %arg0, %c0_i32, %c0_i32_0 : i32, i32, i32
  }
  func.func @transform_1(%arg0: i32) -> (i32, i32) {
    %c0_i32 = arith.constant 0 : i32
    %c0_i32_0 = arith.constant 0 : i32
    %c0_i32_1 = arith.constant 0 : i32
    return %c0_i32, %c0_i32_0 : i32, i32
  }
  func.func @transform_2(%arg0: i32) -> (i32, i32) {
    %c0_i32 = arith.constant 0 : i32
    %c0_i32_0 = arith.constant 0 : i32
    %c0_i32_1 = arith.constant 0 : i32
    return %c0_i32, %c0_i32_0 : i32, i32
  }
  func.func @transform_3(%arg0: i32) -> (i32, i32, i32) {
    %c0_i32 = arith.constant 0 : i32
    %c0_i32_0 = arith.constant 0 : i32
    %c0_i32_1 = arith.constant 0 : i32
    return %arg0, %c0_i32, %c0_i32_0 : i32, i32, i32
  }
}

</mosaic_0001>

<bundles_post_ra>
// kernel: tpu_custom_call.1
= control target key start
LH: loop header
LB: loop body
LE: loop exit
PB: predicated region body
PF: predicated region fallthrough
CT: control target
= control target key end

     0   :  { %8 = vsyncpa [#allocation3], 0  ;;  %s1009_s0 = inlined_call_operand.hbm [shape: f32[2,32,256], index: 0, kind: input, shape index: {}]   ;;  %s1010_s1 = inlined_call_operand.vmem [shape: f32[32,2], index: 1, kind: input, shape index: {}]   ;;  %s1011_s2 = inlined_call_operand.vmem [shape: f32[2,32], index: 2, kind: input, shape index: {}]   ;;  %s1012_s3 = inlined_call_operand.hbm [shape: f32[2,32,256], index: 3, kind: output, shape index: {}]  }
   0x1   :  { %10 = vsyncpa [#allocation3 + $0x1], 0 }
   0x2   :  { %11 = vsyncpa [#allocation4], 0 }
   0x3   :  { %13 = vsyncpa [#allocation4 + $0x1], 0  ;;  %s794_s12 = smov 0   ;;  %s796_s13 = smov 0  }
   0x4   :  { %s798_s14 = smov 0   ;;  %s800_s15 = smov 0  }
   0x5 LB: > { %s815_s16 = sadd.s32 4294967295, %s764_s15   ;;  %s573_s17 = sadd.s32 4294967294, %s764_s15   ;;  %s764_s15 = sphi %s800_s15, %s1027_s15   ;;  %s760_s14 = sphi %s798_s14, %s1026_s14   ;;  %s756_s13 = sphi %s796_s13, %s1025_s13   ;;  %s752_s12 = sphi %s794_s12, %s1024_s12  }
   0x6   : > { %s819_s18 = sadd.s32 1, %s764_s15   ;;  %s26_s19 = sadd.s32 1, %s760_s14 }
   0x7   : > { %s23_s20 = ssub.s32 %s764_s15, %s819_s18  ;;  %p33_p0 = scmp.ne.s32.totalorder %s760_s14, %s756_s13 }
   0x8   : > { %p24_p1 = scmp.eq.s32.totalorder %s23_s20, 0  ;;  %p34_p2 = scmp.eq.s32.totalorder %s764_s15, 0 }
   0x9   : > { %p39_p3 = scmp.ne.s32.totalorder %s756_s13, %s752_s12  ;;  %p40_p4 = scmp.eq.s32.totalorder %s815_s16, 0 }
   0xa   : > { %s831_s21 = scalar_select %p24_p1, %s760_s14, %s26_s19  }
   0xb   : > { %p833_p5 = por %p34_p2, %p33_p0  ;;  %p837_p6 = por %p40_p4, %p39_p3 }
   0xc   : > { %p105_p7 = scmp.eq.s32.totalorder %s815_s16, 1  ;;  %p111_p8 = scmp.eq.s32.totalorder %s573_s17, 1 }
   0xd   : > { %s1016_s23 = scalar_select %p837_p6, 1, 0 }
   0xe   : > { %p628_p10 = scmp.lt.s32.totalorder %s764_s15, 2  ;;  %p844_p11 = por %p105_p7, %p33_p0 }
   0xf   : > { %p848_p12 = por %p111_p8, %p39_p3  ;;  %s137_s26 = sand.u32 1, %s760_s14  }
  0x10   : > { %s1017_s24 = scalar_select %p844_p11, 1, 0 }
  0x11   : > { %s1018_s25 = scalar_select %p848_p12, 1, 0 }
  0x12   : > { %s591_s27 = sshll.u32 %s764_s15, 10  ;;  %s576_s28 = sshll.u32 %s137_s26, 6 }
  0x13   : > { %s857_s4 = scalar_lea.hbm %s1009_s0, %s591_s27  ;;  %s141_s5 = scalar_lea.vmem [#allocation2], %s576_s28 }
  0x14   : > { %s148_s6 = sshll.u32 %s141_s5, 4  ;;  %p861_p13 = pnand %p628_p10, %p833_p5  ;;  %s865_s6 = int_to_ptr.vmem [resolvable:$true] %s148_s6 }
  0x15   : > { %s867_s8 = scalar_lea.sflag [#allocation3], %s137_s26  ;;  %s672_s9 = scalar_lea.hbm %s857_s4, 1024 }
  0x16   : > { %p673_p0 = scmp.ne.s32.totalorder %s857_s4, %s672_s9  ;;  %p674_p1 = pneg %p861_p13 }
  0x17   : > { %s677_s17 = scalar_lea.hbm %s1009_s0, 2048  ;;  %p678_p4 = scmp.lt.s32.totalorder %s857_s4, %s1009_s0 }
  0x18   : > { %p675_p2 = pnand %p674_p1, %p673_p0  ;;  %p679_p5 = scmp.lt.s32.totalorder %s677_s17, %s672_s9 }
  0x1a   : > { %p676_p3 = pneg %p675_p2  ;;  %p680_p7 = por %p679_p5, %p678_p4 }
  0x1c   : > { %p681_p8 = pnand %p680_p7, %p676_p3 }
  0x1e   : > { %684 = shalt.err (!%p681_p8)
}
  0x1f   : > { %s685_s22 = scalar_lea.vmem %s865_s6, 1024  ;;  %s766_s26 = smov [#allocation2]  }
  0x20   : > { %p686_p10 = scmp.ne.s32.totalorder %s865_s6, %s685_s22  ;;  %s690_s27 = sshll.u32 %s766_s26, 4  ;;  %s691_s27 = int_to_ptr.vmem [resolvable:$false] %s690_s27 }
  0x21   : > { %s692_s28 = scalar_lea.vmem %s691_s27, 2048  ;;  %p693_p2 = scmp.lt.s32.totalorder %s865_s6, %s691_s27 }
  0x22   : > { %p688_p9 = pnand %p686_p10, %p674_p1  ;;  %p694_p12 = scmp.lt.s32.totalorder %s692_s28, %s685_s22 }
  0x24   : > { %p689_p0 = pneg %p688_p9  ;;  %p695_p11 = por %p694_p12, %p693_p2 }
  0x26   : > { %p696_p6 = pnand %p695_p11, %p689_p0 }
  0x28   : > { %699 = shalt.err (!%p696_p6)
}
  0x29   : > { %s767_s29 = smov 256   ;;  %s768_s30 = smov 16  }
  0x2a   : > { %623 = dma.hbm_to_vmem [thread:$0]  (!%p861_p13), %s857_s4, 1024, %s865_s6, %s867_s8, %s767_s29, %s767_s29, %s768_s30  }
  0x2b   : > { %p579_p9 = scmp.ge.s32.totalorder %s764_s15, 1  ;;  %p156_p1 = scmp.lt.s32.totalorder %s764_s15, 3 }
  0x2d   : > { %p157_p3 = pnand %p579_p9, %p156_p1 }
  0x2e   : > { %s891_s5 = sand.u32 (!%p157_p3), 1, %s756_s13   ;;  %p1020_p6 = scmp.ne.s32.totalorder (!%p157_p3), %s1016_s23, 0 }
  0x2f   : > { %160 = sbr.rel (%p157_p3) target bundleno = 777 (0x309), region = 32  ;;  %s580_s9 = sshll.u32 (!%p157_p3), %s891_s5, 6 }
  0x30   : > { %s163_s10 = scalar_lea.sflag (!%p157_p3), [#allocation3], %s891_s5  ;;  %s166_s11 = scalar_lea.vmem (!%p157_p3), [#allocation2], %s580_s9 }
  0x34   : > { %743 = dma.done.wait (%p1020_p6), %s163_s10, 1024  }
  0x35   : > { %745 = vsyncadd (%p1020_p6), %s163_s10, 4294966272  ;;  %v901_v0 = vld [vmem:[%s166_s11 + $0x20] sm:$0xff]  ;;  %v903_v1 = vld [vmem:[%s166_s11 + $0x28] sm:$0xff]  ;;  %v769_v16 = vmov 0.0   ;;  %vm770_vm0 = vmmov 0   ;;  %v229_v21 = vlaneseq  ;;  %vm240_vm1 = vcmask 130112  }
  0x36   : > { %v905_v2 = vld [vmem:[%s166_s11] sm:$0xff]  ;;  %v203_v3 = vadd.f32 %v903_v1, %v901_v0  ;;  %v909_v4 = vld [vmem:[%s166_s11 + $0x8] sm:$0xff]  ;;  %v911_v5 = vld [vmem:[%s166_s11 + $0x30] sm:$0xff]  ;;  %v219_v15 = vmax.f32 %v901_v0, %v903_v1  ;;  %600 = vmatprep.subr.mxu0 %v769_v16  ;;  %611 = vmatprep.subr.mxu1 %v769_v16  ;;  %vm247_vm2 = vcmask 195712   ;;  %vm254_vm3 = vcmask 261312   ;;  %s188_s27 = scalar_lea.vmem [#allocation5], %s580_s9 }
  0x37   : > { %v913_v6 = vld [vmem:[%s166_s11 + $0x38] sm:$0xff]  ;;  %v197_v7 = vadd.f32 %v909_v4, %v905_v2  ;;  %v917_v8 = vld [vmem:[%s166_s11 + $0x10] sm:$0xff]  ;;  %v213_v13 = vmax.f32 %v905_v2, %v909_v4  ;;  %v284_v19 = vld [vmem:[%s1010_s1 + $0x8] sm:$0xff]  ;;  %608 = vmatprep.mubr.msk.f32.mxu0 %vm770_vm0, %v769_v16  ;;  %613 = vmatprep.mubr.msk.f32.mxu1 %vm770_vm0, %v769_v16  ;;  %v230_v22 = vand.u32 127, %v229_v21  ;;  %v232_v25 = vshrl.u32 %v229_v21, 7  ;;  %s500_s28 = sshll.u32 %s188_s27, 4  ;;  %s959_s28 = int_to_ptr.vmem [resolvable:$true] %s500_s28 }
  0x38   : > { %v919_v9 = vld [vmem:[%s166_s11 + $0x18] sm:$0xff]  ;;  %204 = vadd.xlane.f32.xlu1 %v203_v3  ;;  %v206_v10 = vadd.f32 %v913_v6, %v911_v5  ;;  %v222_v14 = vmax.f32 %v911_v5, %v913_v6  ;;  %v285_v18 = vld [vmem:[%s1010_s1 + $0x10] sm:$0xff]  ;;  %v283_v20 = vld [vmem:[%s1010_s1] sm:$0xff]  ;;  %vm281_vm4 = vcmask 1040384   ;;  %vm287_vm5 = vcmask 261120   ;;  %s592_s29 = sshll.u32 %s815_s16, 10 }
  0x39   : > { %198 = vadd.xlane.f32.xlu0 %v197_v7  ;;  %v200_v11 = vadd.f32 %v919_v9, %v917_v8  ;;  %v216_v12 = vmax.f32 %v917_v8, %v919_v9  ;;  %v286_v17 = vld [vmem:[%s1010_s1 + $0x18] sm:$0xff]  ;;  %v235_v24 = vadd.s32 4294967288, %v230_v22  ;;  %v242_v27 = vadd.s32 4294967280, %v230_v22  ;;  %v362_v58 = vld [vmem:[%s1011_s2] sm:$0x3]  ;;  %s964_s10 = scalar_lea.hbm %s1012_s3, %s592_s29  ;;  %s487_s16 = scalar_lea.sflag [#allocation4], %s891_s5 }
  0x3a   : > { %601 = vmatpush3.msra.mxu0 %v286_v17  ;;  %v233_v30 = vsub.s32 %v230_v22, %v232_v25  ;;  %v249_v32 = vadd.s32 4294967272, %v230_v22  ;;  %vm367_vm6 = vcmask 1041408   ;;  %vm363_vm7 = vcmask 15360   ;;  %s700_s11 = scalar_lea.vmem %s959_s28, 1024  ;;  %p1021_p12 = scmp.ne.s32.totalorder %s1017_s24, 0 }
  0x3b   : > { %602 = vmatprep.subr.mxu0 %v769_v16  ;;  %v238_v29 = vsub.s32 %v235_v24, %v232_v25  ;;  %v245_v35 = vsub.s32 %v242_v27, %v232_v25  ;;  %612 = vmatpush3.msk.msra.mxu1 %vm367_vm6, %v362_v58  ;;  %p701_p11 = scmp.ne.s32.totalorder %s959_s28, %s700_s11  ;;  %s771_s23 = smov [#allocation5]  }
  0x3c   : > { %207 = vadd.xlane.f32.xlu1 %v206_v10  ;;  %603 = vmatpush3.msra.mxu0 %v285_v18  ;;  %v252_v40 = vsub.s32 %v249_v32, %v232_v25  ;;  %s704_s4 = sshll.u32 %s771_s23, 4  ;;  %s705_s4 = int_to_ptr.vmem [resolvable:$false] %s704_s4 }
  0x3d   : > { %201 = vadd.xlane.f32.xlu0 %v200_v11  ;;  %604 = vmatprep.subr.mxu0 %v769_v16  ;;  %p702_p13 = pnand %p701_p11, %p1021_p12  ;;  %s706_s6 = scalar_lea.vmem %s705_s4, 2048 }
  0x3e   : > { %605 = vmatpush3.msra.mxu0 %v284_v19  ;;  %p707_p5 = scmp.lt.s32.totalorder %s959_s28, %s705_s4  ;;  %p708_p7 = scmp.lt.s32.totalorder %s706_s6, %s700_s11 }
  0x3f   : > { %606 = vmatprep.subr.mxu0 %v769_v16  ;;  %p703_p4 = pneg %p702_p13 }
  0x40   : > { %217 = vmax.xlane.f32.xlu1 %v216_v12  ;;  %607 = vmatpush3.msra.mxu0 %v283_v20  ;;  %p709_p8 = por %p708_p7, %p707_p5 }
  0x41   : > { %214 = vmax.xlane.f32.xlu0 %v213_v13  ;;  %v453_v13 = vsub.s32 0, %v232_v25 }
  0x42   : > { %p710_p10 = pnand %p709_p8, %p703_p4 }
  0x44   : > { %223 = vmax.xlane.f32.xlu1 %v222_v14 }
  0x45   : > { %220 = vmax.xlane.f32.xlu0 %v219_v15 }
  0xc1   : > { %v205_v23 = vpop.xlane.xlu1 %204 }
  0xc2   : > { %v199_v26 = vpop.xlane.xlu0 %198  ;;  %v211_v36 = vmul.f32 0.00390625, %v205_v23 }
  0xc3   : > { %v209_v31 = vmul.f32 0.00390625, %v199_v26 }
  0xc4   : > { %v246_v46 = vrot.slane %v211_v36, %v245_v35 }
  0xc5   : > { %v208_v28 = vpop.xlane.xlu1 %207  ;;  %v234_v39 = vrot.slane %v209_v31, %v233_v30 }
  0xc6   : > { %v202_v33 = vpop.xlane.xlu0 %201  ;;  %v212_v41 = vmul.f32 0.00390625, %v208_v28 }
  0xc7   : > { %v210_v34 = vmul.f32 0.00390625, %v202_v33 }
  0xc8   : > { %v253_v48 = vrot.slane %v212_v41, %v252_v40 }
  0xc9   : > { %v239_v37 = vrot.slane %v210_v34, %v238_v29  ;;  %v218_v38 = vpop.xlane.xlu1 %217 }
  0xca   : > { %v215_v42 = vpop.xlane.xlu0 %214  ;;  %v268_v44 = vrot.slane %v218_v38, %v238_v29 }
  0xcb   : > { %v241_v43 = vsel %vm240_vm1, %v239_v37, %v234_v39  ;;  %v264_v45 = vrot.slane %v215_v42, %v233_v30 }
  0xcc   : > { %v248_v52 = vsel %vm247_vm2, %v246_v46, %v241_v43 }
  0xcd   : > { %v224_v47 = vpop.xlane.xlu1 %223  ;;  %v269_v53 = vsel %vm240_vm1, %v268_v44, %v264_v45  ;;  %v255_v56 = vsel %vm254_vm3, %v253_v48, %v248_v52 }
  0xce   : > { %v221_v49 = vpop.xlane.xlu0 %220  ;;  %v278_v50 = vrot.slane %v224_v47, %v252_v40 }
  0xcf   : > { %v273_v51 = vrot.slane %v221_v49, %v245_v35 }
  0xd1   : > { %v274_v54 = vsel %vm247_vm2, %v273_v51, %v269_v53 }
  0xd2   : > { %v279_v55 = vsel %vm254_vm3, %v278_v50, %v274_v54 }
  0xd3   : > { %v282_v57 = vsel %vm281_vm4, %v255_v56, %v279_v55 }
  0xd4   : > { %609 = vmatmul.mubr.msk.f32.vlgmr.msra.gmra.mxu0 %vm287_vm5, %v282_v57 }
 0x194   : > { %v357_v59 = vpop.f32.mrf.mxu0 }
 0x195   : > { %v361_v60 = vmax.f32 %v357_v59, 0.0 }
 0x196   : > { %v610_v61 = vpop.f32.mrf.mxu0 }
 0x197   : > { %614 = vmatmul.mubr.msk.f32.vlgmr.msra.gmra.mxu1 %vm363_vm7, %v361_v60 }
 0x257   : > { %v437_v62 = vpop.f32.mrf.mxu1 }
 0x258   : > { %v442_v63 = vrot.slane %v437_v62, 1 }
 0x259   : > { %v615_v3 = vpop.f32.mrf.mxu1 }
 0x25a   : > { %v444_v7 = vadd.f32 %v442_v63, %v437_v62 }
 0x25c   : > { %v585_v10 = vmul.f32 -1.442695, %v444_v7 }
 0x25e   : > { %668 = vpow2.f32 %v585_v10 }
 0x26b   : > { %v669_v11 = vpop.eup %668 }
 0x26c   : > { %v448_v12 = vadd.f32 1.0, %v669_v11 }
 0x26e   : > { %670 = vrcp.f32 %v448_v12 }
 0x27b   : > { %v671_v14 = vpop.eup %670 }
 0x27c   : > { %v454_v15 = vrot.slane %v671_v14, %v453_v13 }
 0x27e   : > { %460 = vbcast.lane.b32.xlu1 %v454_v15, 264  ;;  %456 = vbcast.lane.b32.xlu0 %v454_v15, 256 }
 0x282   : > { %464 = vbcast.lane.b32.xlu1 %v454_v15, 272 }
 0x286   : > { %468 = vbcast.lane.b32.xlu1 %v454_v15, 280 }
 0x2f0   : > { %v461_v16 = vpop.permute.xlu1 %460  ;;  %v457_v17 = vpop.permute.xlu0 %456 }
 0x2f1   : > { %v472_v18 = vmul.f32 %v461_v16, %v917_v8  ;;  %v473_v19 = vmul.f32 %v461_v16, %v919_v9  ;;  %v470_v20 = vmul.f32 %v457_v17, %v905_v2  ;;  %v471_v21 = vmul.f32 %v457_v17, %v909_v4 }
 0x2f3   : > { %480 = vst [vmem:[%s188_s27 + $0x10] sm:$0xff] %v472_v18  ;;  %481 = vst [vmem:[%s188_s27 + $0x18] sm:$0xff] %v473_v19 }
 0x2f4   : > { %478 = vst [vmem:[%s188_s27] sm:$0xff] %v470_v20  ;;  %479 = vst [vmem:[%s188_s27 + $0x8] sm:$0xff] %v471_v21  ;;  %v465_v22 = vpop.permute.xlu1 %464 }
 0x2f5   : > { %v474_v23 = vmul.f32 %v465_v22, %v901_v0  ;;  %v475_v8 = vmul.f32 %v465_v22, %v903_v1 }
 0x2f7   : > { %482 = vst [vmem:[%s188_s27 + $0x20] sm:$0xff] %v474_v23  ;;  %483 = vst [vmem:[%s188_s27 + $0x28] sm:$0xff] %v475_v8 }
 0x2f8   : > { %v469_v2 = vpop.permute.xlu1 %468 }
 0x2f9   : > { %v476_v4 = vmul.f32 %v469_v2, %v911_v5  ;;  %v477_v0 = vmul.f32 %v469_v2, %v913_v6 }
 0x2fb   : > { %484 = vst [vmem:[%s188_s27 + $0x30] sm:$0xff] %v476_v4  ;;  %485 = vst [vmem:[%s188_s27 + $0x38] sm:$0xff] %v477_v0 }
 0x2fc   : > { %713 = shalt.err (!%p710_p10)
}
 0x2fd   : > { %s714_s7 = scalar_lea.hbm %s964_s10, 1024  ;;  %s718_s19 = scalar_lea.hbm %s1012_s3, 2048 }
 0x2fe   : > { %p715_p0 = scmp.ne.s32.totalorder %s964_s10, %s714_s7  ;;  %p719_p1 = scmp.lt.s32.totalorder %s964_s10, %s1012_s3 }
 0x2ff   : > { %p720_p3 = scmp.lt.s32.totalorder %s718_s19, %s714_s7 }
 0x300   : > { %p716_p2 = pnand %p715_p0, %p1021_p12 }
 0x301   : > { %p721_p6 = por %p720_p3, %p719_p1 }
 0x302   : > { %p717_p9 = pneg %p716_p2 }
 0x304   : > { %p722_p11 = pnand %p721_p6, %p717_p9 }
 0x306   : > { %725 = shalt.err (!%p722_p11)
}
 0x307   : > { %s772_s26 = smov 256   ;;  %s773_s27 = smov 16  }
 0x308   : > { %618 = dma.vmem_to_hbm [thread:$0]  (%p1021_p12), %s959_s28, 1024, %s964_s10, %s487_s16, %s772_s26, %s772_s26, %s773_s27  }
 0x309 PF: > { %s515_s29 = sand.u32 1, %s752_s12   ;;  %p1022_p13 = scmp.ne.s32.totalorder %s1018_s25, 0 }
 0x30a   : > { %p1023_p4 = scmp.ge.s32.totalorder %s764_s15, 2  ;;  %s516_s30 = scalar_lea.sflag [#allocation4], %s515_s29 }
 0x30c   : > { %p625_p5 = pnand %p1023_p4, %p1022_p13 }
 0x30e   : > { %p626_p7 = pneg %p625_p5 }
 0x310   : > { %747 = dma.done.wait (%p626_p7), %s516_s30, 1024  }
 0x311   : > { %749 = vsyncadd (%p626_p7), %s516_s30, 4294966272  ;;  %p16_p8 = scmp.ge.s32.totalorder %s819_s18, 4   ;;  %s1024_s12 = smov %s756_s13 }
 0x312   : > { %s1025_s13 = smov %s760_s14  ;;  %s1026_s14 = smov %s831_s21 }
 0x313   : > { %s1027_s15 = smov %s819_s18  ;;  %18 = sbr.rel (!%p16_p8) target bundleno = 5 (0x5), region = 77 }
 0x318   :  { %521 = vsyncpa [#allocation3], 1 }
 0x319   :  { %523 = vsyncpa [#allocation3 + $0x1], 1 }
 0x31a   :  { %524 = vsyncpa [#allocation4], 1 }
 0x31b   :  { %526 = vsyncpa [#allocation4 + $0x1], 1 }

</bundles_post_ra>
